<compile_context>
chip_gen: v7x
topology: tpu7x:2x2x1
jax: 0.10.0
libtpu: 0.0.40
codegen_flags: <defaults>
</compile_context>

<pallas_src>
import functools

import jax
import jax.numpy as jnp
from jax.experimental import pallas as pl
from jax.experimental.pallas import tpu as pltpu


def _round_up(v, m):
    return (v + m - 1) // m * m


def _cdiv(a, b):
    return -(-a // b)


# Default double-buffered x-tile budget.  Fits the 32 MiB scoped VMEM we
# request explicitly below (v5e/v6e have 128 MiB physical, v7x has 64 MiB
# physical per TensorCore, so 32 MiB scoped is safe on every generation).
_DEFAULT_X_BUDGET = 24 * 1024 * 1024
_VMEM_LIMIT = 32 * 1024 * 1024


def _sigmoid_exact(logits):
    # Exact sigmoid: exp runs on the EUP; the single f32 divide acts on a
    # (tb, 1) tile in the epilogue, far off the DMA critical path.
    # Stable for very negative logits: exp(-z) -> inf => 1/(1+inf) = 0.
    return 1.0 / (1.0 + jnp.exp(-logits))


def _logreg_kernel_single(x_ref, w_ref, b_ref, o_ref):
    # Fast path: the whole feature dim fits one VMEM tile.
    # x_ref: (tb, D), w_ref: (D, 1), b_ref: (1, 1) SMEM, o_ref: (tb, 1).
    logits = jnp.dot(x_ref[...], w_ref[...],
                     preferred_element_type=jnp.float32) + b_ref[0, 0]
    o_ref[...] = _sigmoid_exact(logits).astype(o_ref.dtype)


def _logreg_kernel_tiled(x_ref, w_ref, b_ref, o_ref, acc_ref, *,
                         tk, d_valid, needs_mask):
    # K-tiled path.
    # x_ref:   (tb, tk)    input tile
    # w_ref:   (d_pad, 1)  whole weight column, resident across the K axis
    # b_ref:   (1, 1)      bias scalar (SMEM)
    # o_ref:   (tb, 1)     probabilities (written on the last K step)
    # acc_ref: (tb, 1)     f32 logit accumulator (VMEM scratch)
    k = pl.program_id(1)

    @pl.when(k == 0)
    def _init():
        acc_ref[...] = jnp.zeros_like(acc_ref)

    x = x_ref[...]
    if needs_mask:
        # The last K tile extends past D; its tail lanes come from a padded
        # (undefined) read and may be NaN/Inf.  Zero them before the dot --
        # relying on zero weight rows alone is unsafe (0 * NaN = NaN).
        col = jax.lax.broadcasted_iota(jnp.int32, x.shape, 1) + k * tk
        x = jnp.where(col < d_valid, x, jnp.zeros_like(x))

    # Slice this step's rows out of the resident weight column (128-aligned
    # static-stride start -> aligned VMEM load, no extra DMA).
    w = w_ref[pl.ds(pl.multiple_of(k * tk, 128), tk), :]

    # Partial dot on the MXU with f32 accumulation (VALU/XLU stay free).
    acc_ref[...] += jnp.dot(x, w, preferred_element_type=jnp.float32)

    @pl.when(k == pl.num_programs(1) - 1)
    def _finalize():
        logits = acc_ref[...] + b_ref[0, 0]
        o_ref[...] = _sigmoid_exact(logits).astype(o_ref.dtype)


def logistic_regression_forward(x, weight, bias, *,
                                x_tile_vmem_bytes=_DEFAULT_X_BUDGET):
    """Pallas equivalent of torch.sigmoid(nn.Linear(input_dim, 1)(x)).

    x:      (B, D) float32 (pass bfloat16 to halve HBM reads; the wrapper does
            not cast -- casting would itself be a full read+write pass)
    weight: (1, D) float32 (torch nn.Linear weight layout)
    bias:   (1,)   float32
    returns (B, 1) with x.dtype
    """
    B, D = x.shape
    assert weight.shape == (1, D)
    assert bias.shape == (1,)

    itemsize = jnp.dtype(x.dtype).itemsize

    # ---- Batch tiling: balanced, no padding of x. ----
    # Target enough rows per step that each DMA step is multi-MiB (amortizes
    # the ~0.35 us per-grid-step overhead), capped at 4096 rows.
    row_bytes = max(D, 1) * itemsize
    tb_target = max(512, min(x_tile_vmem_bytes // (2 * row_bytes), 4096))
    tb_target = max(8, (tb_target // 8) * 8)
    n_b = _cdiv(B, tb_target)
    tb = _round_up(_cdiv(B, n_b), 8)
    if tb >= B:
        tb = B                      # full-extent block: no (8,...) requirement
    grid_b = _cdiv(B, tb)           # ragged last block: OOB rows are discarded

    # ---- Feature (reduction) tiling. ----
    tk_max = max(128, (x_tile_vmem_bytes // (2 * tb * itemsize)) // 128 * 128)

    w_col = weight.reshape(D, 1).astype(x.dtype)       # (D, 1) column for MXU
    bias_smem = bias.reshape(1, 1).astype(jnp.float32)
    out_shape = jax.ShapeDtypeStruct((B, 1), x.dtype)

    if D <= tk_max:
        # Single K block: whole feature dim resident, no accumulator, no pad.
        return pl.pallas_call(
            _logreg_kernel_single,
            out_shape=out_shape,
            grid_spec=pltpu.PrefetchScalarGridSpec(
                num_scalar_prefetch=0,
                grid=(grid_b,),
                in_specs=[
                    pl.BlockSpec((tb, D), lambda i: (i, 0)),           # x tile
                    pl.BlockSpec((D, 1), lambda i: (0, 0)),            # weight
                    pl.BlockSpec(memory_space=pltpu.MemorySpace.SMEM), # bias
                ],
                out_specs=pl.BlockSpec((tb, 1), lambda i: (i, 0)),
            ),
            compiler_params=pltpu.CompilerParams(
                # "parallel" lets the runtime shard the batch axis across the
                # two TensorCores on v7x; it is a no-op on v5e/v6e.
                dimension_semantics=("parallel",),
                vmem_limit_bytes=_VMEM_LIMIT,
            ),
        )(x, w_col, bias_smem)

    # ---- K-tiled path (very wide feature dim). ----
    n_k = _cdiv(D, tk_max)
    tk = _round_up(_cdiv(D, n_k), 128)
    d_pad = n_k * tk
    # Zero-pad ONLY the tiny (D, 1) weight column -- never x itself.
    if d_pad != D:
        w_col = jnp.pad(w_col, ((0, d_pad - D), (0, 0)))

    kernel = functools.partial(_logreg_kernel_tiled,
                               tk=tk, d_valid=D, needs_mask=(d_pad != D))

    return pl.pallas_call(
        kernel,
        out_shape=out_shape,
        grid_spec=pltpu.PrefetchScalarGridSpec(
            num_scalar_prefetch=0,
            grid=(grid_b, n_k),
            in_specs=[
                pl.BlockSpec((tb, tk), lambda i, k: (i, k)),           # x tile
                pl.BlockSpec((d_pad, 1), lambda i, k: (0, 0)),         # weight (resident)
                pl.BlockSpec(memory_space=pltpu.MemorySpace.SMEM),     # bias
            ],
            out_specs=pl.BlockSpec((tb, 1), lambda i, k: (i, 0)),
            scratch_shapes=[pltpu.VMEM((tb, 1), jnp.float32)],
        ),
        compiler_params=pltpu.CompilerParams(
            dimension_semantics=("parallel", "arbitrary"),
            vmem_limit_bytes=_VMEM_LIMIT,
        ),
    )(x, w_col, bias_smem)


def reference_forward(x, weight, bias):
    logits = jnp.dot(x, weight.T, precision=jax.lax.Precision.HIGHEST) + bias
    return jax.nn.sigmoid(logits)


if __name__ == "__main__":
    key = jax.random.PRNGKey(0)
    kx, kw, kb = jax.random.split(key, 3)

    # --- Small demo at the module's natural shapes: x (batch, input_dim). ---
    batch, input_dim = 8, 32
    bound = 1.0 / (input_dim ** 0.5)
    weight = jax.random.uniform(kw, (1, input_dim), jnp.float32, -bound, bound)
    bias = jax.random.uniform(kb, (1,), jnp.float32, -bound, bound)
    x = jax.random.normal(kx, (batch, input_dim), dtype=jnp.float32)

    out = jax.block_until_ready(logistic_regression_forward(x, weight, bias))
    ref = reference_forward(x, weight, bias)
    assert out.shape == (batch, 1)
    assert jnp.allclose(out, ref, atol=2e-3, rtol=0.0)

    # --- Second check: ragged B and D + K-tiled reduction (tiny artificial
    #     VMEM budget forces the multi-K-step path and the in-kernel D mask).
    k2x, k2w, k2b = jax.random.split(jax.random.PRNGKey(1), 3)
    b2, d2 = 1000, 700
    bound2 = 1.0 / (d2 ** 0.5)
    w2 = jax.random.uniform(k2w, (1, d2), jnp.float32, -bound2, bound2)
    bi2 = jax.random.uniform(k2b, (1,), jnp.float32, -bound2, bound2)
    x2 = jax.random.normal(k2x, (b2, d2), dtype=jnp.float32)

    out2 = jax.block_until_ready(
        logistic_regression_forward(x2, w2, bi2,
                                    x_tile_vmem_bytes=256 * 1024))
    ref2 = reference_forward(x2, w2, bi2)
    assert out2.shape == (b2, 1)
    assert jnp.allclose(out2, ref2, atol=2e-3, rtol=0.0)

    print("KERNEL_OK")
</pallas_src>

<mosaic_0001>
module attributes {stable_mosaic.version = 11 : i64} {
  func.func @_logreg_kernel_single(%arg0: i32, %arg1: memref<8x32xf32, #tpu.memory_space<vmem>>, %arg2: memref<32x1xf32, #tpu.memory_space<vmem>>, %arg3: memref<1x1xf32, #tpu.memory_space<smem>>, %arg4: memref<8x1xf32, #tpu.memory_space<vmem>>) attributes {dimension_semantics = [#tpu.dimension_semantics<parallel>], iteration_bounds = array<i64: 1>, scalar_prefetch = 0 : i64, scratch_operands = 0 : i64, tpu.core_type = #tpu.core_type<tc>, window_params = [{transform_indices = @transform_0, window_bounds = array<i64: 8, 32>}, {pipeline_mode = #tpu.pipeline_mode<synchronous>, transform_indices = @transform_1, window_bounds = array<i64: 32, 1>}, {transform_indices = @transform_2, window_bounds = array<i64: 1, 1>}, {transform_indices = @transform_3, window_bounds = array<i64: 8, 1>}]} {
    %c0 = arith.constant 0 : index
    %c0_0 = arith.constant 0 : index
    %0 = vector.load %arg1[%c0, %c0_0] : memref<8x32xf32, #tpu.memory_space<vmem>>, vector<8x32xf32>
    %c0_1 = arith.constant 0 : index
    %c0_2 = arith.constant 0 : index
    %1 = vector.load %arg2[%c0_1, %c0_2] : memref<32x1xf32, #tpu.memory_space<vmem>>, vector<32x1xf32>
    %cst = arith.constant dense<0.000000e+00> : vector<8x1xf32>
    %2 = tpu.matmul %0, %1, %cst {dimension_numbers = #tpu.dot_dimension_numbers<[1], [0], [0], [1], [0, 0, 1, 1], [], []>} : vector<8x32xf32>, vector<32x1xf32>, vector<8x1xf32> -> vector<8x1xf32>
    %c0_3 = arith.constant 0 : index
    %c0_4 = arith.constant 0 : index
    %3 = memref.load %arg3[%c0_3, %c0_4] : memref<1x1xf32, #tpu.memory_space<smem>>
    %4 = vector.broadcast %3 : f32 to vector<8x1xf32>
    %5 = arith.addf %2, %4 : vector<8x1xf32>
    %cst_5 = arith.constant 0.000000e+00 : f32
    %6 = vector.broadcast %cst_5 : f32 to vector<8x1xf32>
    %7 = arith.subf %6, %5 : vector<8x1xf32>
    %8 = math.exp %7 : vector<8x1xf32>
    %cst_6 = arith.constant 1.000000e+00 : f32
    %9 = vector.broadcast %cst_6 : f32 to vector<8x1xf32>
    %10 = arith.addf %9, %8 : vector<8x1xf32>
    %cst_7 = arith.constant 1.000000e+00 : f32
    %11 = vector.broadcast %cst_7 : f32 to vector<8x1xf32>
    %12 = arith.divf %11, %10 : vector<8x1xf32>
    %c0_8 = arith.constant 0 : index
    %c0_9 = arith.constant 0 : index
    %13 = vector.load %arg4[%c0_8, %c0_9] : memref<8x1xf32, #tpu.memory_space<vmem>>, vector<8x1xf32>
    tpu.vector_store %arg4[%c0_8, %c0_9], %12 {strides = array<i32>} : memref<8x1xf32, #tpu.memory_space<vmem>>, vector<8x1xf32>,
    return
  }
  func.func @transform_0(%arg0: i32) -> (i32, i32) {
    %c0_i32 = arith.constant 0 : i32
    %c0_i32_0 = arith.constant 0 : i32
    return %arg0, %c0_i32 : i32, i32
  }
  func.func @transform_1(%arg0: i32) -> (i32, i32) {
    %c0_i32 = arith.constant 0 : i32
    %c0_i32_0 = arith.constant 0 : i32
    %c0_i32_1 = arith.constant 0 : i32
    return %c0_i32, %c0_i32_0 : i32, i32
  }
  func.func @transform_2(%arg0: i32) -> (i32, i32) {
    %c0_i32 = arith.constant 0 : i32
    %c0_i32_0 = arith.constant 0 : i32
    %c0_i32_1 = arith.constant 0 : i32
    return %c0_i32, %c0_i32_0 : i32, i32
  }
  func.func @transform_3(%arg0: i32) -> (i32, i32) {
    %c0_i32 = arith.constant 0 : i32
    %c0_i32_0 = arith.constant 0 : i32
    return %arg0, %c0_i32 : i32, i32
  }
}

</mosaic_0001>

<bundles_post_ra>
// kernel: tpu_custom_call.1
= control target key start
LH: loop header
LB: loop body
LE: loop exit
PB: predicated region body
PF: predicated region fallthrough
CT: control target
= control target key end

     0   :  { %v138_v0 = vmov 0.0|0.0   ;;  %vm139_vm0 = vmmov 0   ;;  %v140_v4 = vmov 0.0   ;;  %vm22_vm1 = vcmask 261120   ;;  %s182_s1 = inlined_call_operand.vmem [shape: f32[32,1], index: 1, kind: input, shape index: {}]   ;;  %s183_s0 = inlined_call_operand.vmem [shape: f32[8,32], index: 0, kind: input, shape index: {}]   ;;  %s184_s2 = inlined_call_operand.<no memory space> [shape: f32[1,1], index: 2, kind: input, shape index: {}]   ;;  %s185_s3 = inlined_call_operand.vmem [shape: f32[8,1], index: 3, kind: output, shape index: {}]  }
   0x1   :  { %125 = vmatprep.subr.bf16.mxu0 %v138_v0  ;;  %v16_v1 = vld [vmem:[%s182_s1] sm:$0xff]  ;;  %v17_v2 = vld [vmem:[%s182_s1 + $0x8] sm:$0xff]  ;;  %v18_v3 = vld [vmem:[%s182_s1 + $0x10] sm:$0xff]  ;;  %122 = vmatprep.mubr.msk.f32.mxu0 %vm139_vm0, %v140_v4  ;;  %v21_v9 = vstv %s184_s2  ;;  %vm102_vm2 = vcmask 7168  }
   0x2   :  { %v126_v5 = vpack.c.bf16 %v17_v2, %v16_v1  ;;  %v19_v6 = vld [vmem:[%s182_s1 + $0x18] sm:$0xff]  ;;  %v15_v8 = vld [vmem:[%s183_s0] sm:$0xff] }
   0x3   :  { %v129_v7 = vpack.c.bf16 %v19_v6, %v18_v3 }
   0x4   :  { %127 = vmatpush3.bf16.msra.mxu0 %v126_v5 }
   0x5   :  { %128 = vmatprep.subr.bf16.mxu0 %v138_v0 }
   0x8   :  { %130 = vmatpush3.bf16.msra.mxu0 %v129_v7 }
   0xb   :  { %123 = vmatmul.mubr.msk.f32.vlgmr.msra.gmra.mrb[0].mxu0 %vm22_vm1, %v15_v8 }
  0xde   :  { %v92_v10 = vpop.f32.mrb[0].mxu0 }
  0xdf   :  { %v93_v11 = vadd.f32 %v92_v10, %v21_v9  ;;  %v124_v12 = vpop.f32.mrb[1].mxu0 }
  0xe1   :  { %v96_v13 = vsub.f32 0.0, %v93_v11 }
  0xe3   :  { %v97_v14 = vmul.f32 1.442695, %v96_v13 }
  0xe5   :  { %134 = vpow2.f32 %v97_v14 }
  0xef   :  { %v135_v15 = vpop.eup %134 }
  0xf0   :  { %v99_v16 = vadd.f32 1.0, %v135_v15 }
  0xf2   :  { %136 = vrcp.f32 %v99_v16 }
  0xfc   :  { %v137_v17 = vpop.eup %136 }
  0xfd   :  { %103 = vst.msk [vmem:[%s185_s3] sm:$0xff] %vm102_vm2, %v137_v17 }

</bundles_post_ra>
